<compile_context>
chip_gen: v6e
topology: v6e:2x2x1
jax: 0.10.0
libtpu: 0.0.40
codegen_flags: <defaults>
</compile_context>

<pallas_src>
import jax
import jax.numpy as jnp
from jax import lax
from jax.experimental import pallas as pl
from jax.experimental.pallas import tpu as pltpu
import numpy as np


def _round_up(n: int, m: int) -> int:
    return ((n + m - 1) // m) * m


def _proj_kernel(x_ref, w_ref, b_ref, o_ref):
    # x_ref: (tm, K)  w_ref: (K, tn)  b_ref: (1, tn)  o_ref: (tm, tn)
    acc = jnp.dot(x_ref[...], w_ref[...], preferred_element_type=jnp.float32)
    o_ref[...] = (acc + b_ref[...]).astype(o_ref.dtype)


def _pick_tn(E: int) -> int:
    """Output-lane tile: full E for small embed dims, else a 128-multiple."""
    if E <= 512:
        return E
    for cand in (512, 256, 128):
        if E % cand == 0:
            return cand
    return E


def _patch_proj(patches, w2d, bias, *, tm, out_dtype):
    M, K = patches.shape
    _, E = w2d.shape
    tn = _pick_tn(E)
    n_m = M // tm
    n_n = E // tn
    bias2d = bias.reshape(1, E).astype(jnp.float32)

    bytes_accessed = (patches.size * patches.dtype.itemsize
                      + w2d.size * w2d.dtype.itemsize
                      + bias2d.size * 4
                      + M * E * jnp.dtype(out_dtype).itemsize)
    cost = pl.CostEstimate(flops=2 * M * K * E, transcendentals=0,
                           bytes_accessed=bytes_accessed)

    return pl.pallas_call(
        _proj_kernel,
        out_shape=jax.ShapeDtypeStruct((M, E), out_dtype),
        grid_spec=pltpu.PrefetchScalarGridSpec(
            num_scalar_prefetch=0,
            # N outer / M inner: the (K, tn) weight block stays VMEM-resident
            # across all M steps of a given N tile.
            grid=(n_n, n_m),
            in_specs=[
                pl.BlockSpec((tm, K), lambda j, i: (i, 0)),
                pl.BlockSpec((K, tn), lambda j, i: (0, j)),
                pl.BlockSpec((1, tn), lambda j, i: (0, j)),
            ],
            out_specs=pl.BlockSpec((tm, tn), lambda j, i: (i, j)),
        ),
        compiler_params=pltpu.CompilerParams(
            dimension_semantics=("parallel", "parallel"),
            # Let XLA fuse the patchify transpose/reshape/pad into the input
            # DMA so the patch matrix is never written back to HBM.
            allow_input_fusion=[True, False, False],
            vmem_limit_bytes=48 * 1024 * 1024,
        ),
        cost_estimate=cost,
    )(patches, w2d, bias2d)


def patch_embed_2d(x, weight, bias, *, img_size, patch_size, in_chans,
                   flatten=True, in_chan_last=True, tm=512,
                   compute_dtype=None):
    """Pallas implementation of PatchEmbed2D.forward (norm_layer=None => Identity).

    x:      (B, L, S) with S = H*W*C
    weight: (E, C, ph, pw)   (PyTorch Conv2d layout)
    bias:   (E,)
    compute_dtype: optional streaming dtype (e.g. jnp.bfloat16); accumulation
                   stays f32 on the MXU, output stays in x.dtype.
    returns (B*L, num_patches, E) when flatten=True, else (B*L, E, gh, gw)
    """
    B, L, S = x.shape
    H, W = img_size
    ph, pw = patch_size
    C = in_chans
    assert S == H * W * C, "Input image total size doesn't match model configuration"
    gh, gw = H // ph, W // pw
    E = weight.shape[0]
    K = ph * pw * C

    if in_chan_last:
        xr = x.reshape(B * L, gh, ph, gw, pw, C)
        xr = jnp.transpose(xr, (0, 1, 3, 2, 4, 5))          # (BL, gh, gw, ph, pw, C)
    else:
        xr = x.reshape(B * L, C, gh, ph, gw, pw)
        xr = jnp.transpose(xr, (0, 2, 4, 3, 5, 1))          # (BL, gh, gw, ph, pw, C)

    patches = xr.reshape(B * L * gh * gw, K)                # (M, K)
    # conv weight (E, C, ph, pw) -> (ph, pw, C, E) -> (K, E), matching (kh, kw, c)
    w2d = jnp.transpose(weight, (2, 3, 1, 0)).reshape(K, E)

    out_dtype = x.dtype
    if compute_dtype is not None:
        patches = patches.astype(compute_dtype)
        w2d = w2d.astype(compute_dtype)

    # Tile selection: largest VMEM-friendly M tile, always a multiple of 8.
    M = patches.shape[0]
    tm = int(min(tm, _round_up(M, 8)))
    tm = _round_up(tm, 8)
    Mp = _round_up(M, tm)
    if Mp != M:
        patches = jnp.pad(patches, ((0, Mp - M), (0, 0)))

    out = _patch_proj(patches, w2d, bias, tm=tm, out_dtype=out_dtype)
    if Mp != M:
        out = out[:M]

    out = out.reshape(B * L, gh * gw, E)                    # flatten(2).transpose(1,2)
    if not flatten:
        out = out.reshape(B * L, gh, gw, E).transpose(0, 3, 1, 2)
    # norm = Identity (norm_layer=None)
    return out


def _reference(x, weight, bias, *, img_size, patch_size, in_chans,
               in_chan_last=True):
    """Pure-JAX reference using lax.conv (NCHW), mirroring the PyTorch module."""
    B, L, S = x.shape
    H, W = img_size
    ph, pw = patch_size
    C = in_chans
    if in_chan_last:
        xi = x.reshape(B * L, H, W, C).transpose(0, 3, 1, 2)    # NCHW
    else:
        xi = x.reshape(B * L, C, H, W)
    y = lax.conv_general_dilated(
        xi, weight, window_strides=(ph, pw), padding="VALID",
        dimension_numbers=("NCHW", "OIHW", "NCHW"))
    y = y + bias.reshape(1, -1, 1, 1)
    E = weight.shape[0]
    y = y.reshape(B * L, E, -1).transpose(0, 2, 1)              # (BL, num_patches, E)
    return y


def _make_params(key, in_chans, patch_size, embed_dim):
    kw, kb = jax.random.split(key)
    fan_in = in_chans * patch_size[0] * patch_size[1]
    bound = 1.0 / np.sqrt(fan_in)
    weight = jax.random.uniform(kw, (embed_dim, in_chans, *patch_size),
                                minval=-bound, maxval=bound, dtype=jnp.float32)
    bias = jax.random.uniform(kb, (embed_dim,), minval=-bound, maxval=bound,
                              dtype=jnp.float32)
    return weight, bias


def _run_case(key, *, B, L, img_size, patch_size, in_chans, embed_dim,
              in_chan_last, compute_dtype, rtol, atol):
    kx, kp = jax.random.split(key)
    S = img_size[0] * img_size[1] * in_chans
    x = jax.random.normal(kx, (B, L, S), dtype=jnp.float32)
    weight, bias = _make_params(kp, in_chans, patch_size, embed_dim)

    out = patch_embed_2d(x, weight, bias, img_size=img_size,
                         patch_size=patch_size, in_chans=in_chans,
                         in_chan_last=in_chan_last,
                         compute_dtype=compute_dtype)
    out = jax.block_until_ready(out)

    ref = _reference(x, weight, bias, img_size=img_size,
                     patch_size=patch_size, in_chans=in_chans,
                     in_chan_last=in_chan_last)
    ref = jax.block_until_ready(ref)

    num_patches = (img_size[0] // patch_size[0]) * (img_size[1] // patch_size[1])
    assert out.shape == (B * L, num_patches, embed_dim), out.shape
    np.testing.assert_allclose(np.asarray(out, dtype=np.float32),
                               np.asarray(ref, dtype=np.float32),
                               rtol=rtol, atol=atol)


if __name__ == "__main__":
    key = jax.random.PRNGKey(0)
    k1, k2, k3 = jax.random.split(key, 3)

    # Case 1: f32 end-to-end, channel-last input (tight tolerance).
    _run_case(k1, B=2, L=2, img_size=(16, 16), patch_size=(4, 4),
              in_chans=3, embed_dim=32, in_chan_last=True,
              compute_dtype=None, rtol=1e-5, atol=1e-4)

    # Case 2: bf16 streaming of patches/weight, f32 MXU accumulation.
    _run_case(k2, B=2, L=2, img_size=(16, 16), patch_size=(4, 4),
              in_chans=3, embed_dim=32, in_chan_last=True,
              compute_dtype=jnp.bfloat16, rtol=5e-2, atol=5e-2)

    # Case 3: channel-first input, M not a multiple of 8 (exercises padding).
    _run_case(k3, B=1, L=1, img_size=(12, 16), patch_size=(4, 4),
              in_chans=3, embed_dim=32, in_chan_last=False,
              compute_dtype=None, rtol=1e-5, atol=1e-4)

    print("KERNEL_OK")
</pallas_src>

<mosaic_0001>
module attributes {stable_mosaic.version = 11 : i64} {
  func.func @_proj_kernel(%arg0: i32, %arg1: i32, %arg2: memref<64x48xf32, #tpu.memory_space<vmem>>, %arg3: memref<48x32xf32, #tpu.memory_space<vmem>>, %arg4: memref<1x32xf32, #tpu.memory_space<vmem>>, %arg5: memref<64x32xf32, #tpu.memory_space<vmem>>) attributes {dimension_semantics = [#tpu.dimension_semantics<parallel>, #tpu.dimension_semantics<parallel>], iteration_bounds = array<i64: 1, 1>, scalar_prefetch = 0 : i64, scratch_operands = 0 : i64, tpu.core_type = #tpu.core_type<tc>, window_params = [{transform_indices = @transform_0, window_bounds = array<i64: 64, 48>}, {transform_indices = @transform_1, window_bounds = array<i64: 48, 32>}, {transform_indices = @transform_2, window_bounds = array<i64: 1, 32>}, {transform_indices = @transform_3, window_bounds = array<i64: 64, 32>}]} {
    %c0 = arith.constant 0 : index
    %c0_0 = arith.constant 0 : index
    %0 = vector.load %arg2[%c0, %c0_0] : memref<64x48xf32, #tpu.memory_space<vmem>>, vector<64x48xf32>
    %c0_1 = arith.constant 0 : index
    %c0_2 = arith.constant 0 : index
    %1 = vector.load %arg3[%c0_1, %c0_2] : memref<48x32xf32, #tpu.memory_space<vmem>>, vector<48x32xf32>
    %cst = arith.constant dense<0.000000e+00> : vector<64x32xf32>
    %2 = tpu.matmul %0, %1, %cst {dimension_numbers = #tpu.dot_dimension_numbers<[1], [0], [0], [1], [0, 0, 1, 1], [], []>} : vector<64x48xf32>, vector<48x32xf32>, vector<64x32xf32> -> vector<64x32xf32>
    %c0_3 = arith.constant 0 : index
    %c0_4 = arith.constant 0 : index
    %3 = vector.load %arg4[%c0_3, %c0_4] : memref<1x32xf32, #tpu.memory_space<vmem>>, vector<1x32xf32>
    %4 = vector.broadcast %3 : vector<1x32xf32> to vector<64x32xf32>
    %5 = arith.addf %2, %4 : vector<64x32xf32>
    %c0_5 = arith.constant 0 : index
    %c0_6 = arith.constant 0 : index
    %6 = vector.load %arg5[%c0_5, %c0_6] : memref<64x32xf32, #tpu.memory_space<vmem>>, vector<64x32xf32>
    tpu.vector_store %arg5[%c0_5, %c0_6], %5 {strides = array<i32>} : memref<64x32xf32, #tpu.memory_space<vmem>>, vector<64x32xf32>,
    return
  }
  func.func @transform_0(%arg0: i32, %arg1: i32) -> (i32, i32) {
    %c0_i32 = arith.constant 0 : i32
    %c0_i32_0 = arith.constant 0 : i32
    return %arg1, %c0_i32 : i32, i32
  }
  func.func @transform_1(%arg0: i32, %arg1: i32) -> (i32, i32) {
    %c0_i32 = arith.constant 0 : i32
    %c0_i32_0 = arith.constant 0 : i32
    return %c0_i32, %arg0 : i32, i32
  }
  func.func @transform_2(%arg0: i32, %arg1: i32) -> (i32, i32) {
    %c0_i32 = arith.constant 0 : i32
    %c0_i32_0 = arith.constant 0 : i32
    return %c0_i32, %arg0 : i32, i32
  }
  func.func @transform_3(%arg0: i32, %arg1: i32) -> (i32, i32) {
    %c0_i32 = arith.constant 0 : i32
    return %arg1, %arg0 : i32, i32
  }
}

</mosaic_0001>

<bundles_post_ra>
// kernel: tpu_custom_call.1
= control target key start
LH: loop header
LB: loop body
LE: loop exit
PB: predicated region body
PF: predicated region fallthrough
CT: control target
= control target key end

     0   :  { %vm35_vm0 = vcmask 392192   ;;  %vm165_vm1 = vcmask 261120   ;;  %s342_s1 = inlined_call_operand.vmem [shape: f32[48,32], index: 1, kind: input, shape index: {}]   ;;  %s343_s0 = inlined_call_operand.vmem [shape: f32[64,48], index: 0, kind: input, shape index: {}]   ;;  %s344_s2 = inlined_call_operand.vmem [shape: f32[1,32], index: 2, kind: input, shape index: {}]   ;;  %s345_s3 = inlined_call_operand.vmem [shape: f32[64,32], index: 3, kind: output, shape index: {}]  }
   0x1   :  { %v27_v0 = vld [vmem:[%s342_s1 + $0x28] sm:$0xff]  ;;  %v26_v1 = vld [vmem:[%s342_s1 + $0x20] sm:$0xff]  ;;  %v25_v2 = vld [vmem:[%s342_s1 + $0x18] sm:$0xff] }
   0x2   :  { %201 = vmatprep.subr.mxu0 %v27_v0  ;;  %225 = vmatprep.subr.mxu1 %v27_v0  ;;  %v24_v3 = vld [vmem:[%s342_s1 + $0x10] sm:$0xff]  ;;  %v23_v4 = vld [vmem:[%s342_s1 + $0x8] sm:$0xff]  ;;  %v22_v5 = vld [vmem:[%s342_s1] sm:$0xff] }
   0x3   :  { %202 = vmatpush3.msra.mxu0 %v27_v0  ;;  %231 = vmatpush3.msra.mxu1 %v27_v0  ;;  %v14_v6 = vld [vmem:[%s343_s0] sm:$0xff]  ;;  %v15_v8 = vld [vmem:[%s343_s0 + $0x8] sm:$0xff]  ;;  %v16_v10 = vld [vmem:[%s343_s0 + $0x10] sm:$0xff] }
   0x4   :  { %203 = vmatprep.subr.mxu0 %v26_v1  ;;  %226 = vmatprep.subr.mxu1 %v26_v1  ;;  %v18_v7 = vld [vmem:[%s343_s0 + $0x20] sm:$0xff]  ;;  %v19_v9 = vld [vmem:[%s343_s0 + $0x28] sm:$0xff]  ;;  %v20_v11 = vld [vmem:[%s343_s0 + $0x30] sm:$0xff] }
   0x5   :  { %204 = vmatpush3.msra.mxu0 %v26_v1  ;;  %232 = vmatpush3.msra.mxu1 %v26_v1  ;;  %v17_v12 = vld [vmem:[%s343_s0 + $0x18] sm:$0xff]  ;;  %v178_v14 = vld [vmem:[%s344_s2] ss:$0 sm:$0xff] }
   0x6   :  { %205 = vmatprep.subr.mxu0 %v25_v2  ;;  %227 = vmatprep.subr.mxu1 %v25_v2  ;;  %v21_v13 = vld [vmem:[%s343_s0 + $0x38] sm:$0xff] }
   0x7   :  { %206 = vmatpush3.msra.mxu0 %v25_v2  ;;  %233 = vmatpush3.msra.mxu1 %v25_v2 }
   0x8   :  { %207 = vmatprep.subr.mxu0 %v24_v3  ;;  %228 = vmatprep.subr.mxu1 %v24_v3 }
   0x9   :  { %208 = vmatpush3.msra.mxu0 %v24_v3  ;;  %234 = vmatpush3.msra.mxu1 %v24_v3 }
   0xa   :  { %209 = vmatprep.subr.mxu0 %v23_v4  ;;  %229 = vmatprep.subr.mxu1 %v23_v4 }
   0xb   :  { %210 = vmatpush3.msra.mxu0 %v23_v4  ;;  %235 = vmatpush3.msra.mxu1 %v23_v4 }
   0xc   :  { %211 = vmatprep.subr.mxu0 %v22_v5  ;;  %230 = vmatprep.subr.mxu1 %v22_v5 }
   0xd   :  { %212 = vmatpush3.msra.mxu0 %v22_v5  ;;  %236 = vmatpush3.msra.mxu1 %v22_v5 }
   0xe   :  { %213 = vmatprep.mubr.msk.f32.mxu0 %vm35_vm0, %v14_v6  ;;  %219 = vmatprep.mubr.msk.f32.mxu1 %vm35_vm0, %v18_v7 }
   0xf   :  { %214 = vmatmul.mubr.msk.f32.vlgmr.msra.gmra.mxu0 %vm35_vm0, %v15_v8  ;;  %220 = vmatmul.mubr.msk.f32.vlgmr.msra.gmra.mxu1 %vm35_vm0, %v19_v9 }
  0x10   :  { %216 = vmatprep.mubr.msk.f32.mxu0 %vm35_vm0, %v16_v10  ;;  %222 = vmatprep.mubr.msk.f32.mxu1 %vm35_vm0, %v20_v11 }
  0x13   :  { %217 = vmatmul.mubr.msk.f32.gmra.mxu0 %vm35_vm0, %v17_v12  ;;  %223 = vmatmul.mubr.msk.f32.gmra.mxu1 %vm35_vm0, %v21_v13 }
  0xcf   :  { %v215_v15 = vpop.f32.mrf.mxu0  ;;  %v221_v16 = vpop.f32.mrf.mxu1 }
  0xd0   :  { %v132_v17 = vadd.f32 %v215_v15, %v178_v14  ;;  %v152_v18 = vadd.f32 %v221_v16, %v178_v14 }
  0xd1   :  { %v126_v19 = vpop.f32.mrf.mxu0  ;;  %v146_v20 = vpop.f32.mrf.mxu1 }
  0xd2   :  { %167 = vst.msk [vmem:[%s345_s3 + $0x8] sm:$0xff] %vm165_vm1, %v132_v17  ;;  %171 = vst.msk [vmem:[%s345_s3 + $0x28] sm:$0xff] %vm165_vm1, %v152_v18  ;;  %v127_v21 = vadd.f32 %v178_v14, %v126_v19  ;;  %v147_v22 = vadd.f32 %v178_v14, %v146_v20 }
  0xd3   :  { %v218_v23 = vpop.f32.mrf.mxu0  ;;  %v224_v24 = vpop.f32.mrf.mxu1 }
  0xd4   :  { %166 = vst.msk [vmem:[%s345_s3] sm:$0xff] %vm165_vm1, %v127_v21  ;;  %170 = vst.msk [vmem:[%s345_s3 + $0x20] sm:$0xff] %vm165_vm1, %v147_v22  ;;  %v142_v25 = vadd.f32 %v218_v23, %v178_v14  ;;  %v162_v26 = vadd.f32 %v224_v24, %v178_v14 }
  0xd5   :  { %v136_v27 = vpop.f32.mrf.mxu0  ;;  %v156_v28 = vpop.f32.mrf.mxu1 }
  0xd6   :  { %169 = vst.msk [vmem:[%s345_s3 + $0x18] sm:$0xff] %vm165_vm1, %v142_v25  ;;  %173 = vst.msk [vmem:[%s345_s3 + $0x38] sm:$0xff] %vm165_vm1, %v162_v26  ;;  %v137_v29 = vadd.f32 %v178_v14, %v136_v27  ;;  %v157_v30 = vadd.f32 %v178_v14, %v156_v28 }
  0xd8   :  { %168 = vst.msk [vmem:[%s345_s3 + $0x10] sm:$0xff] %vm165_vm1, %v137_v29  ;;  %172 = vst.msk [vmem:[%s345_s3 + $0x30] sm:$0xff] %vm165_vm1, %v157_v30 }

</bundles_post_ra>
